<compile_context>
chip_gen: v5e
topology: v5e:2x2
jax: 0.10.0
libtpu: 0.0.40
codegen_flags: <defaults>
</compile_context>

<pallas_src>
import jax
import jax.numpy as jnp
from jax.experimental import pallas as pl
from jax.experimental.pallas import tpu as pltpu


def _round_up(a: int, b: int) -> int:
    return ((a + b - 1) // b) * b


def adapter_kernel(x_ref, w1_ref, b1_ref, w2_ref, b2_ref, o_ref):
    # proj_in: (tm, Din) @ (Din, Dbn) -> (tm, Dbn), f32 accumulation on the MXU.
    h = jnp.dot(x_ref[...], w1_ref[...], preferred_element_type=jnp.float32)
    # bias + ReLU in f32 on the VPU.
    h = jnp.maximum(h + b1_ref[...], 0.0)
    # proj_out: explicit choice — cast activations to the weight streaming dtype
    # (no-op for f32; bf16 when stream_dtype=bf16), accumulate in f32.
    o = jnp.dot(h.astype(w2_ref.dtype), w2_ref[...],
                preferred_element_type=jnp.float32)
    o_ref[...] = (o + b2_ref[...]).astype(o_ref.dtype)


def adapter_forward(x, w1, b1, w2, b2, *, tm=2048, stream_dtype=None):
    """Fused Adapter forward.

    x : (..., input_dim)
    w1: (bottleneck_dim, input_dim),  b1: (bottleneck_dim,)   (nn.Linear layout)
    w2: (output_dim, bottleneck_dim), b2: (output_dim,)
    Returns (..., output_dim) in x.dtype.
    """
    orig_shape = x.shape
    input_dim = orig_shape[-1]
    bottleneck_dim = w1.shape[0]
    output_dim = w2.shape[0]
    out_dtype = x.dtype

    x2d = x.reshape(-1, input_dim)
    M = x2d.shape[0]

    # Pre-transpose the (tiny) weights once in the wrapper -> kernel does
    # MXU-native (M,K)@(K,N) with no in-kernel .T on loop-invariant operands.
    w1t = jnp.asarray(w1).T                      # (input_dim, bottleneck_dim)
    w2t = jnp.asarray(w2).T                      # (bottleneck_dim, output_dim)
    b1_2d = jnp.asarray(b1).reshape(1, bottleneck_dim).astype(jnp.float32)
    b2_2d = jnp.asarray(b2).reshape(1, output_dim).astype(jnp.float32)

    if stream_dtype is not None:
        # bf16 streaming (recommended on v6e/v7x); accumulation stays f32.
        x2d = x2d.astype(stream_dtype)
        w1t = w1t.astype(stream_dtype)
        w2t = w2t.astype(stream_dtype)

    # Effective M tile: multiple of 8 (sublane), capped by the (padded) M.
    tm_eff = min(_round_up(tm, 8), _round_up(M, 8))
    M_pad = _round_up(M, tm_eff)
    if M_pad != M:
        x2d = jnp.pad(x2d, ((0, M_pad - M), (0, 0)))

    grid = (M_pad // tm_eff,)

    out2d = pl.pallas_call(
        adapter_kernel,
        out_shape=jax.ShapeDtypeStruct((M_pad, output_dim), out_dtype),
        grid_spec=pltpu.PrefetchScalarGridSpec(
            num_scalar_prefetch=0,
            grid=grid,
            in_specs=[
                pl.BlockSpec((tm_eff, input_dim), lambda i: (i, 0)),           # x tile
                pl.BlockSpec((input_dim, bottleneck_dim), lambda i: (0, 0)),   # W1^T (resident)
                pl.BlockSpec((1, bottleneck_dim), lambda i: (0, 0)),           # b1
                pl.BlockSpec((bottleneck_dim, output_dim), lambda i: (0, 0)),  # W2^T (resident)
                pl.BlockSpec((1, output_dim), lambda i: (0, 0)),               # b2
            ],
            out_specs=pl.BlockSpec((tm_eff, output_dim), lambda i: (i, 0)),
        ),
        compiler_params=pltpu.CompilerParams(
            dimension_semantics=("parallel",),       # shard grid across TCs (v7x)
            vmem_limit_bytes=32 * 1024 * 1024,       # safe on v5e/v6e/v7x
        ),
    )(x2d, w1t, b1_2d, w2t, b2_2d)

    out2d = out2d[:M]
    return out2d.reshape(*orig_shape[:-1], output_dim)


def adapter_ref(x, w1, b1, w2, b2):
    h = jnp.maximum(x @ w1.T + b1, 0.0)
    return h @ w2.T + b2


if __name__ == "__main__":
    # Small shapes consistent with the module: seq of tokens with hidden=32.
    batch, seq = 2, 8
    input_dim, bottleneck_dim, output_dim = 32, 16, 32

    key = jax.random.PRNGKey(0)
    kx, kw1, kb1, kw2, kb2 = jax.random.split(key, 5)

    x = jax.random.normal(kx, (batch, seq, input_dim), dtype=jnp.float32)
    # Deterministic synthetic parameters (nn.Linear layout: (out, in)).
    w1 = jax.random.normal(kw1, (bottleneck_dim, input_dim), jnp.float32) * 0.1
    b1 = jax.random.normal(kb1, (bottleneck_dim,), jnp.float32) * 0.1
    w2 = jax.random.normal(kw2, (output_dim, bottleneck_dim), jnp.float32) * 0.1
    b2 = jax.random.normal(kb2, (output_dim,), jnp.float32) * 0.1

    out = adapter_forward(x, w1, b1, w2, b2, tm=2048)
    jax.block_until_ready(out)
    ref = adapter_ref(x, w1, b1, w2, b2)
    assert out.shape == ref.shape
    assert jnp.allclose(out, ref, atol=1e-5, rtol=1e-5), "mismatch vs reference"

    # Ragged M (exercises the pad-to-tile / slice tail path with a big tile).
    x2 = jax.random.normal(jax.random.PRNGKey(1), (3, 5, input_dim), jnp.float32)
    out2 = adapter_forward(x2, w1, b1, w2, b2, tm=2048)
    jax.block_until_ready(out2)
    ref2 = adapter_ref(x2, w1, b1, w2, b2)
    assert out2.shape == ref2.shape
    assert jnp.allclose(out2, ref2, atol=1e-5, rtol=1e-5), "mismatch (ragged M)"

    print("KERNEL_OK")
</pallas_src>

<mosaic_0001>
module attributes {stable_mosaic.version = 11 : i64} {
  func.func @adapter_kernel(%arg0: i32, %arg1: memref<16x32xf32, #tpu.memory_space<vmem>>, %arg2: memref<32x16xf32, #tpu.memory_space<vmem>>, %arg3: memref<1x16xf32, #tpu.memory_space<vmem>>, %arg4: memref<16x32xf32, #tpu.memory_space<vmem>>, %arg5: memref<1x32xf32, #tpu.memory_space<vmem>>, %arg6: memref<16x32xf32, #tpu.memory_space<vmem>>) attributes {dimension_semantics = [#tpu.dimension_semantics<parallel>], iteration_bounds = array<i64: 1>, scalar_prefetch = 0 : i64, scratch_operands = 0 : i64, tpu.core_type = #tpu.core_type<tc>, window_params = [{transform_indices = @transform_0, window_bounds = array<i64: 16, 32>}, {pipeline_mode = #tpu.pipeline_mode<synchronous>, transform_indices = @transform_1, window_bounds = array<i64: 32, 16>}, {pipeline_mode = #tpu.pipeline_mode<synchronous>, transform_indices = @transform_2, window_bounds = array<i64: 1, 16>}, {pipeline_mode = #tpu.pipeline_mode<synchronous>, transform_indices = @transform_3, window_bounds = array<i64: 16, 32>}, {pipeline_mode = #tpu.pipeline_mode<synchronous>, transform_indices = @transform_4, window_bounds = array<i64: 1, 32>}, {transform_indices = @transform_5, window_bounds = array<i64: 16, 32>}]} {
    %c0 = arith.constant 0 : index
    %c0_0 = arith.constant 0 : index
    %0 = vector.load %arg1[%c0, %c0_0] : memref<16x32xf32, #tpu.memory_space<vmem>>, vector<16x32xf32>
    %c0_1 = arith.constant 0 : index
    %c0_2 = arith.constant 0 : index
    %1 = vector.load %arg2[%c0_1, %c0_2] : memref<32x16xf32, #tpu.memory_space<vmem>>, vector<32x16xf32>
    %cst = arith.constant dense<0.000000e+00> : vector<16x16xf32>
    %2 = tpu.matmul %0, %1, %cst {dimension_numbers = #tpu.dot_dimension_numbers<[1], [0], [0], [1], [0, 0, 1, 1], [], []>} : vector<16x32xf32>, vector<32x16xf32>, vector<16x16xf32> -> vector<16x16xf32>
    %c0_3 = arith.constant 0 : index
    %c0_4 = arith.constant 0 : index
    %3 = vector.load %arg3[%c0_3, %c0_4] : memref<1x16xf32, #tpu.memory_space<vmem>>, vector<1x16xf32>
    %4 = vector.broadcast %3 : vector<1x16xf32> to vector<16x16xf32>
    %5 = arith.addf %2, %4 : vector<16x16xf32>
    %cst_5 = arith.constant 0.000000e+00 : f32
    %6 = vector.broadcast %cst_5 : f32 to vector<16x16xf32>
    %7 = arith.maximumf %5, %6 : vector<16x16xf32>
    %c0_6 = arith.constant 0 : index
    %c0_7 = arith.constant 0 : index
    %8 = vector.load %arg4[%c0_6, %c0_7] : memref<16x32xf32, #tpu.memory_space<vmem>>, vector<16x32xf32>
    %cst_8 = arith.constant dense<0.000000e+00> : vector<16x32xf32>
    %9 = tpu.matmul %7, %8, %cst_8 {dimension_numbers = #tpu.dot_dimension_numbers<[1], [0], [0], [1], [0, 0, 1, 1], [], []>} : vector<16x16xf32>, vector<16x32xf32>, vector<16x32xf32> -> vector<16x32xf32>
    %c0_9 = arith.constant 0 : index
    %c0_10 = arith.constant 0 : index
    %10 = vector.load %arg5[%c0_9, %c0_10] : memref<1x32xf32, #tpu.memory_space<vmem>>, vector<1x32xf32>
    %11 = vector.broadcast %10 : vector<1x32xf32> to vector<16x32xf32>
    %12 = arith.addf %9, %11 : vector<16x32xf32>
    %c0_11 = arith.constant 0 : index
    %c0_12 = arith.constant 0 : index
    %13 = vector.load %arg6[%c0_11, %c0_12] : memref<16x32xf32, #tpu.memory_space<vmem>>, vector<16x32xf32>
    tpu.vector_store %arg6[%c0_11, %c0_12], %12 {strides = array<i32>} : memref<16x32xf32, #tpu.memory_space<vmem>>, vector<16x32xf32>,
    return
  }
  func.func @transform_0(%arg0: i32) -> (i32, i32) {
    %c0_i32 = arith.constant 0 : i32
    %c0_i32_0 = arith.constant 0 : i32
    return %arg0, %c0_i32 : i32, i32
  }
  func.func @transform_1(%arg0: i32) -> (i32, i32) {
    %c0_i32 = arith.constant 0 : i32
    %c0_i32_0 = arith.constant 0 : i32
    %c0_i32_1 = arith.constant 0 : i32
    return %c0_i32, %c0_i32_0 : i32, i32
  }
  func.func @transform_2(%arg0: i32) -> (i32, i32) {
    %c0_i32 = arith.constant 0 : i32
    %c0_i32_0 = arith.constant 0 : i32
    %c0_i32_1 = arith.constant 0 : i32
    return %c0_i32, %c0_i32_0 : i32, i32
  }
  func.func @transform_3(%arg0: i32) -> (i32, i32) {
    %c0_i32 = arith.constant 0 : i32
    %c0_i32_0 = arith.constant 0 : i32
    %c0_i32_1 = arith.constant 0 : i32
    return %c0_i32, %c0_i32_0 : i32, i32
  }
  func.func @transform_4(%arg0: i32) -> (i32, i32) {
    %c0_i32 = arith.constant 0 : i32
    %c0_i32_0 = arith.constant 0 : i32
    %c0_i32_1 = arith.constant 0 : i32
    return %c0_i32, %c0_i32_0 : i32, i32
  }
  func.func @transform_5(%arg0: i32) -> (i32, i32) {
    %c0_i32 = arith.constant 0 : i32
    %c0_i32_0 = arith.constant 0 : i32
    return %arg0, %c0_i32 : i32, i32
  }
}

</mosaic_0001>

<bundles_post_ra>
// kernel: tpu_custom_call.1
= control target key start
LH: loop header
LB: loop body
LE: loop exit
PB: predicated region body
PF: predicated region fallthrough
CT: control target
= control target key end

     0   :  { %s230_s0 = inlined_call_operand.vmem [shape: f32[16,32], index: 0, kind: input, shape index: {}]   ;;  %s231_s1 = inlined_call_operand.vmem [shape: f32[32,16], index: 1, kind: input, shape index: {}]   ;;  %s232_s2 = inlined_call_operand.vmem [shape: f32[1,16], index: 2, kind: input, shape index: {}]   ;;  %s233_s3 = inlined_call_operand.vmem [shape: f32[16,32], index: 3, kind: input, shape index: {}]   ;;  %s234_s4 = inlined_call_operand.vmem [shape: f32[1,32], index: 4, kind: input, shape index: {}]   ;;  %s235_s5 = inlined_call_operand.hbm [shape: f32[16,32], index: 5, kind: output, shape index: {}]  }
   0x1   :  { %v26_v0 = vld [vmem:[%s231_s1 + $0x18] sm:$0xff]  ;;  %v25_v1 = vld [vmem:[%s231_s1 + $0x10] sm:$0xff]  ;;  %v24_v2 = vld [vmem:[%s231_s1 + $0x8] sm:$0xff] }
   0x2   :  { %123 = vmatpush.msra.mxu2 %v26_v0  ;;  %50 = vmatpush.msra.mxu0 %v26_v0 }
   0x4   :  { %124 = vmatpush.msra.mxu2 %v25_v1  ;;  %51 = vmatpush.msra.mxu0 %v25_v1 }
   0x5   :  { %10 = vsyncpa [#allocation3], 0  ;;  %v23_v3 = vld [vmem:[%s231_s1] sm:$0xff]  ;;  %v22_v4 = vld [vmem:[%s230_s0 + $0x8] sm:$0xff]  ;;  %vm31_vm0 = vcmask 261120   ;;  %vm69_vm1 = vcmask 130048  }
   0x6   :  { %125 = vmatpush.msra.mxu2 %v24_v2  ;;  %52 = vmatpush.msra.mxu0 %v24_v2  ;;  %v21_v5 = vld [vmem:[%s230_s0] sm:$0xff]  ;;  %v64_v6 = vld [vmem:[%s233_s3 + $0x8] sm:$0xff]  ;;  %s107_s13 = sshll.u32 %s235_s5, 4  ;;  %s161_s14 = smov 128   ;;  %s108_s13 = int_to_ptr.hbm [resolvable:$true] %s107_s13 }
   0x7   :  { %127 = vmatpush.msra.mxu3 %v64_v6  ;;  %90 = vmatpush.msra.mxu1 %v64_v6  ;;  %v63_v7 = vld [vmem:[%s233_s3] sm:$0xff]  ;;  %s160_s3 = smov [#allocation2]   ;;  %s162_s15 = smov 8  }
   0x8   :  { %126 = vmatpush.msra.mxu2 %v23_v3  ;;  %53 = vmatpush.msra.mxu0 %v23_v3  ;;  %v132_v8 = vld [vmem:[%s232_s2] ss:$0 sm:$0xff]  ;;  %s105_s11 = sshll.u32 %s160_s3, 4  ;;  %s106_s11 = int_to_ptr.vmem [resolvable:$true] %s105_s11 }
   0x9   :  { %120 = vmatmul.msk.f32.vlgmr.msra.gmra.mxu2 %vm31_vm0, %v22_v4  ;;  %119 = vmatmul.msk.f32.vlgmr.msra.gmra.mxu0 %vm31_vm0, %v21_v5  ;;  %v133_v15 = vld [vmem:[%s234_s4] ss:$0 sm:$0xff] }
   0xa   :  { %128 = vmatpush.msra.mxu3 %v63_v7  ;;  %91 = vmatpush.msra.mxu1 %v63_v7 }
  0x86   :  { %v55_v9 = vpop.f32.mrf.mxu0 }
  0x87   :  { %v56_v10 = vadd.f32 %v132_v8, %v55_v9 }
  0x89   :  { %v61_v11 = vmax.f32 %v56_v10, 0.0 }
  0x8b   :  { %121 = vmatmul.msk.f32.vlgmr.msra.gmra.mxu1 %vm69_vm1, %v61_v11 }
  0x8c   :  { %v58_v12 = vpop.f32.mrf.mxu2 }
  0x8d   :  { %v59_v13 = vadd.f32 %v132_v8, %v58_v12 }
  0x8f   :  { %v62_v14 = vmax.f32 %v59_v13, 0.0 }
  0x91   :  { %122 = vmatmul.msk.f32.vlgmr.msra.gmra.mxu3 %vm69_vm1, %v62_v14 }
 0x108   :  { %v93_v16 = vpop.f32.mrf.mxu1 }
 0x109   :  { %v94_v17 = vadd.f32 %v133_v15, %v93_v16 }
 0x10b   :  { %99 = vst.msk [vmem:[#allocation2] sm:$0xff] %vm31_vm0, %v94_v17 }
 0x114   :  { %v96_v18 = vpop.f32.mrf.mxu3 }
 0x115   :  { %v97_v19 = vadd.f32 %v133_v15, %v96_v18 }
 0x117   :  { %100 = vst.msk [vmem:[#allocation2 + $0x8] sm:$0xff] %vm31_vm0, %v97_v19 }
 0x118   :  { %113 = dma.vmem_to_hbm [thread:$0]  %s106_s11, 256, %s108_s13, [#allocation3], %s161_s14, %s161_s14, %s162_s15  }
 0x119   :  { %158 = dma.done.wait [#allocation3], 256  }
 0x11a   :  { %159 = vsyncadd [#allocation3], 4294967040 }
 0x11b   :  { %118 = vsyncpa [#allocation3], 1 }

</bundles_post_ra>
